<compile_context>
chip_gen: v7x
topology: tpu7x:2x2x1
jax: 0.10.0
libtpu: 0.0.40
codegen_flags: <defaults>
</compile_context>

<pallas_src>
import functools

import jax
import jax.numpy as jnp
from jax.experimental import pallas as pl
from jax.experimental.pallas import tpu as pltpu


_LANE_ALIGN = 256          # full-width MXU pushes / stores on v6e & v7x
_TARGET_LANES = 16 * 1024  # ~2 MiB of activation traffic per grid step


def _round_up(x, m):
    return (x + m - 1) // m * m


def split_bg_kernel(x_ref, w_ref, b_ref, o_ref, *, nb, sub, c_mid):
    """x_ref: (nb, C, T) bf16, w_ref: (3, C2, C) bf16, b_ref: (C2, 3) f32,
    o_ref: (nb, C2, T) f32.  All loops below are static / fully unrolled."""
    w1 = w_ref[0]                    # (C2, C)   -- BN scale already folded in
    w2 = w_ref[1, :, :c_mid]         # (C2, C2)
    w3 = w_ref[2, :, :c_mid]         # (C2, C2)
    b = b_ref[...]                   # (C2, 3) f32
    b1 = b[:, 0:1]
    b2 = b[:, 1:2]
    b3 = b[:, 2:3]

    t = x_ref.shape[-1]
    for n in range(nb):                          # images in this grid step
        for c0 in range(0, t, sub):              # vreg-resident sub-chunks
            xs = x_ref[n, :, c0:c0 + sub]        # (C, sub) bf16
            # stage 1: (C2, C) @ (C, sub) -> f32 acc, bias + ReLU
            h = jnp.dot(w1, xs, preferred_element_type=jnp.float32)
            h = jnp.maximum(h + b1, 0.0).astype(jnp.bfloat16)
            # stage 2
            h = jnp.dot(w2, h, preferred_element_type=jnp.float32)
            h = jnp.maximum(h + b2, 0.0).astype(jnp.bfloat16)
            # stage 3
            h = jnp.dot(w3, h, preferred_element_type=jnp.float32)
            h = jnp.maximum(h + b3, 0.0)
            o_ref[n, :, c0:c0 + sub] = h.astype(o_ref.dtype)


def _choose_tile_hw(hw, target=_TARGET_LANES):
    """Largest 256-multiple pixel tile with modest zero-padding waste."""
    hw_aligned = _round_up(hw, _LANE_ALIGN)
    if hw_aligned <= target:
        return hw_aligned
    best_t, best_waste = _LANE_ALIGN, None
    for t in range(target, _LANE_ALIGN - 1, -_LANE_ALIGN):
        waste = _round_up(hw, t) - hw
        if waste * 16 <= hw:         # <= ~6.25% padding: take the largest tile
            return t
        if best_waste is None or waste < best_waste:
            best_t, best_waste = t, waste
    return best_t


def _choose_nb(n, spatial_blocks, tile_hw, target=_TARGET_LANES, cap=32):
    """Images per grid step: amortize per-step overhead for small HW while
    keeping >=2 total grid steps (dual TensorCores on v7x)."""
    want = max(1, min(cap, target // tile_hw))
    total = n * spatial_blocks
    for cand in range(min(want, n), 0, -1):
        if n % cand:
            continue
        steps = (n // cand) * spatial_blocks
        if steps >= 2 or total < 2:
            return cand
    return 1


def prepare_split_bg_params(params):
    """One-time host-side prep: fold inference-mode BN scale into the conv
    weights, transpose to (C_out, C_in), and pack into two arrays."""
    (w1, s1, b1), (w2, s2, b2), (w3, s3, b3) = params
    C, C2 = w1.shape

    def fold(w, s):                  # (Cin, Cout) -> (Cout, Cin), BN folded
        return (w * s[None, :]).T

    wp = jnp.zeros((3, C2, C), jnp.float32)
    wp = wp.at[0].set(fold(w1, s1))
    wp = wp.at[1, :, :C2].set(fold(w2, s2))
    wp = wp.at[2, :, :C2].set(fold(w3, s3))
    bp = jnp.stack([b1, b2, b3], axis=1)        # (C2, 3), stays f32
    return wp.astype(jnp.bfloat16), bp.astype(jnp.float32)


@jax.jit
def split_bg_pallas(x_nchw, w_packed, b_packed):
    """x_nchw: (N, C, H, W) f32.  Returns (N, C//2, H, W) f32."""
    N, C, H, W = x_nchw.shape
    C2 = w_packed.shape[1]
    HW = H * W

    tile_hw = _choose_tile_hw(HW)
    hw_pad = _round_up(HW, tile_hw)
    spatial_blocks = hw_pad // tile_hw
    nb = _choose_nb(N, spatial_blocks, tile_hw)

    # Sub-chunk so each stage's (C2, sub) intermediate stays in vregs.
    sub = 512 if tile_hw % 512 == 0 else _LANE_ALIGN
    sub = min(sub, tile_hw)

    # NCHW -> (N, C, H*W): free reshape; cast to bf16; pad pixels if needed.
    x3d = x_nchw.reshape(N, C, HW).astype(jnp.bfloat16)
    if hw_pad != HW:
        x3d = jnp.pad(x3d, ((0, 0), (0, 0), (0, hw_pad - HW)))

    kernel = functools.partial(split_bg_kernel, nb=nb, sub=sub, c_mid=C2)

    grid = (N // nb, spatial_blocks)
    flops = 2 * N * hw_pad * (C * C2 + 2 * C2 * C2)
    bytes_acc = (2 * N * hw_pad * C          # bf16 activations in
                 + 4 * N * hw_pad * C2       # f32 activations out
                 + 2 * 3 * C2 * C + 4 * C2 * 3)

    out3d = pl.pallas_call(
        kernel,
        out_shape=jax.ShapeDtypeStruct((N, C2, hw_pad), jnp.float32),
        grid_spec=pltpu.PrefetchScalarGridSpec(
            num_scalar_prefetch=0,
            grid=grid,
            in_specs=[
                # activations: channels on sublanes, pixels on lanes
                pl.BlockSpec((nb, C, tile_hw), lambda i, j: (i, 0, j)),
                # packed folded weights + packed biases: resident tiny blocks
                pl.BlockSpec((3, C2, C), lambda i, j: (0, 0, 0)),
                pl.BlockSpec((C2, 3), lambda i, j: (0, 0)),
            ],
            out_specs=pl.BlockSpec((nb, C2, tile_hw), lambda i, j: (i, 0, j)),
        ),
        compiler_params=pltpu.CompilerParams(
            dimension_semantics=("parallel", "parallel")),
        cost_estimate=pl.CostEstimate(flops=flops, transcendentals=0,
                                      bytes_accessed=bytes_acc),
    )(x3d, w_packed, b_packed)

    # Drop the pixel padding and restore NCHW (free reshape).
    return out3d[:, :, :HW].reshape(N, C2, H, W)


def make_params(key, out_channel):
    """Deterministic synthetic params for three conv1x1+BN stages.

    Conv weights stored as (C_in, C_out). BatchNorm (inference mode) is
    expressed as scale = gamma / sqrt(var + eps), bias = beta - mean * scale.
    """
    C = out_channel
    C2 = C // 2
    eps = 1e-5
    keys = jax.random.split(key, 12)
    params = []
    in_c = C
    for stage in range(3):
        kw, kg, kb, km = keys[stage * 4: stage * 4 + 4]
        w = jax.random.normal(kw, (in_c, C2), jnp.float32) * 0.1
        gamma = 1.0 + 0.1 * jax.random.normal(kg, (C2,), jnp.float32)
        beta = 0.1 * jax.random.normal(kb, (C2,), jnp.float32)
        mean = 0.05 * jax.random.normal(km, (C2,), jnp.float32)
        var = jnp.ones((C2,), jnp.float32)
        scale = gamma / jnp.sqrt(var + eps)
        bias = beta - mean * scale
        params.append((w, scale, bias))
        in_c = C2
    return params


def split_bg_ref(x_nchw, params):
    """Pure-JAX f32 reference (un-folded BN math, pixel-major layout)."""
    N, C, H, W = x_nchw.shape
    h = jnp.transpose(x_nchw, (0, 2, 3, 1)).reshape(N * H * W, C)
    for (w, s, b) in params:
        h = jnp.maximum(h @ w * s[None, :] + b[None, :], 0.0)
    C2 = params[-1][0].shape[1]
    return jnp.transpose(h.reshape(N, H, W, C2), (0, 3, 1, 2))


if __name__ == "__main__":
    out_channel = 32                    # module's global `out_channel`
    N, H, W = 2, 16, 16                 # small NCHW input: (2, 32, 16, 16)

    key = jax.random.PRNGKey(0)
    kx, kp = jax.random.split(key)
    x = jax.random.normal(kx, (N, out_channel, H, W), jnp.float32)
    params = make_params(kp, out_channel)

    # BN fold / packing hoisted out of the per-call path (done once).
    w_packed, b_packed = prepare_split_bg_params(params)

    out = jax.block_until_ready(split_bg_pallas(x, w_packed, b_packed))

    ref = split_bg_ref(x, params)
    assert out.shape == (N, out_channel // 2, H, W)
    max_err = float(jnp.max(jnp.abs(out - ref)))
    # bf16 activations/weights (f32 accumulation): a few-percent tolerance.
    assert jnp.allclose(out, ref, atol=5e-2, rtol=5e-2), f"max_err={max_err}"

    print("KERNEL_OK")
</pallas_src>

<mosaic_0001>
module attributes {stable_mosaic.version = 11 : i64} {
  func.func @split_bg_kernel(%arg0: i32, %arg1: i32, %arg2: memref<1x32x256xbf16, #tpu.memory_space<vmem>>, %arg3: memref<3x16x32xbf16, #tpu.memory_space<vmem>>, %arg4: memref<16x3xf32, #tpu.memory_space<vmem>>, %arg5: memref<1x16x256xf32, #tpu.memory_space<vmem>>) attributes {dimension_semantics = [#tpu.dimension_semantics<parallel>, #tpu.dimension_semantics<parallel>], iteration_bounds = array<i64: 2, 1>, scalar_prefetch = 0 : i64, scratch_operands = 0 : i64, tpu.core_type = #tpu.core_type<tc>, window_params = [{transform_indices = @transform_0, window_bounds = array<i64: 1, 32, 256>}, {pipeline_mode = #tpu.pipeline_mode<synchronous>, transform_indices = @transform_1, window_bounds = array<i64: 3, 16, 32>}, {pipeline_mode = #tpu.pipeline_mode<synchronous>, transform_indices = @transform_2, window_bounds = array<i64: 16, 3>}, {transform_indices = @transform_3, window_bounds = array<i64: 1, 16, 256>}]} {
    %c0 = arith.constant 0 : index
    %c0_0 = arith.constant 0 : index
    %c0_1 = arith.constant 0 : index
    %0 = vector.load %arg3[%c0, %c0_0, %c0_1] : memref<3x16x32xbf16, #tpu.memory_space<vmem>>, vector<1x16x32xbf16>
    %1 = vector.shape_cast %0 : vector<1x16x32xbf16> to vector<16x32xbf16>
    %c1 = arith.constant 1 : index
    %c0_2 = arith.constant 0 : index
    %c0_3 = arith.constant 0 : index
    %2 = vector.load %arg3[%c1, %c0_2, %c0_3] : memref<3x16x32xbf16, #tpu.memory_space<vmem>>, vector<1x16x16xbf16>
    %3 = vector.shape_cast %2 : vector<1x16x16xbf16> to vector<16x16xbf16>
    %c2 = arith.constant 2 : index
    %c0_4 = arith.constant 0 : index
    %c0_5 = arith.constant 0 : index
    %4 = vector.load %arg3[%c2, %c0_4, %c0_5] : memref<3x16x32xbf16, #tpu.memory_space<vmem>>, vector<1x16x16xbf16>
    %5 = vector.shape_cast %4 : vector<1x16x16xbf16> to vector<16x16xbf16>
    %c0_6 = arith.constant 0 : index
    %c0_7 = arith.constant 0 : index
    %6 = vector.load %arg4[%c0_6, %c0_7] : memref<16x3xf32, #tpu.memory_space<vmem>>, vector<16x3xf32>
    %7 = vector.extract_strided_slice %6 {offsets = [0, 0], sizes = [16, 1], strides = [1, 1]} : vector<16x3xf32> to vector<16x1xf32>
    %8 = vector.extract_strided_slice %6 {offsets = [0, 1], sizes = [16, 1], strides = [1, 1]} : vector<16x3xf32> to vector<16x1xf32>
    %9 = vector.extract_strided_slice %6 {offsets = [0, 2], sizes = [16, 1], strides = [1, 1]} : vector<16x3xf32> to vector<16x1xf32>
    %c0_8 = arith.constant 0 : index
    %c0_9 = arith.constant 0 : index
    %c0_10 = arith.constant 0 : index
    %10 = vector.load %arg2[%c0_8, %c0_9, %c0_10] : memref<1x32x256xbf16, #tpu.memory_space<vmem>>, vector<1x32x256xbf16>
    %11 = vector.shape_cast %10 : vector<1x32x256xbf16> to vector<32x256xbf16>
    %cst = arith.constant dense<0.000000e+00> : vector<16x256xf32>
    %12 = tpu.matmul %1, %11, %cst {dimension_numbers = #tpu.dot_dimension_numbers<[1], [0], [0], [1], [0, 0, 1, 1], [], []>} : vector<16x32xbf16>, vector<32x256xbf16>, vector<16x256xf32> -> vector<16x256xf32>
    %13 = vector.broadcast %7 : vector<16x1xf32> to vector<16x256xf32>
    %14 = arith.addf %12, %13 : vector<16x256xf32>
    %cst_11 = arith.constant 0.000000e+00 : f32
    %15 = vector.broadcast %cst_11 : f32 to vector<16x256xf32>
    %16 = arith.maximumf %14, %15 : vector<16x256xf32>
    %17 = arith.truncf %16 : vector<16x256xf32> to vector<16x256xbf16>
    %cst_12 = arith.constant dense<0.000000e+00> : vector<16x256xf32>
    %18 = tpu.matmul %3, %17, %cst_12 {dimension_numbers = #tpu.dot_dimension_numbers<[1], [0], [0], [1], [0, 0, 1, 1], [], []>} : vector<16x16xbf16>, vector<16x256xbf16>, vector<16x256xf32> -> vector<16x256xf32>
    %19 = vector.broadcast %8 : vector<16x1xf32> to vector<16x256xf32>
    %20 = arith.addf %18, %19 : vector<16x256xf32>
    %cst_13 = arith.constant 0.000000e+00 : f32
    %21 = vector.broadcast %cst_13 : f32 to vector<16x256xf32>
    %22 = arith.maximumf %20, %21 : vector<16x256xf32>
    %23 = arith.truncf %22 : vector<16x256xf32> to vector<16x256xbf16>
    %cst_14 = arith.constant dense<0.000000e+00> : vector<16x256xf32>
    %24 = tpu.matmul %5, %23, %cst_14 {dimension_numbers = #tpu.dot_dimension_numbers<[1], [0], [0], [1], [0, 0, 1, 1], [], []>} : vector<16x16xbf16>, vector<16x256xbf16>, vector<16x256xf32> -> vector<16x256xf32>
    %25 = vector.broadcast %9 : vector<16x1xf32> to vector<16x256xf32>
    %26 = arith.addf %24, %25 : vector<16x256xf32>
    %cst_15 = arith.constant 0.000000e+00 : f32
    %27 = vector.broadcast %cst_15 : f32 to vector<16x256xf32>
    %28 = arith.maximumf %26, %27 : vector<16x256xf32>
    %c0_16 = arith.constant 0 : index
    %c0_17 = arith.constant 0 : index
    %c0_18 = arith.constant 0 : index
    %29 = vector.load %arg5[%c0_16, %c0_17, %c0_18] : memref<1x16x256xf32, #tpu.memory_space<vmem>>, vector<1x16x256xf32>
    %30 = vector.shape_cast %29 : vector<1x16x256xf32> to vector<16x256xf32>
    %31 = vector.shape_cast %28 : vector<16x256xf32> to vector<1x16x256xf32>
    tpu.vector_store %arg5[%c0_16, %c0_17, %c0_18], %31 {strides = array<i32>} : memref<1x16x256xf32, #tpu.memory_space<vmem>>, vector<1x16x256xf32>,
    return
  }
  func.func @transform_0(%arg0: i32, %arg1: i32) -> (i32, i32, i32) {
    %c0_i32 = arith.constant 0 : i32
    %c0_i32_0 = arith.constant 0 : i32
    return %arg0, %c0_i32, %arg1 : i32, i32, i32
  }
  func.func @transform_1(%arg0: i32, %arg1: i32) -> (i32, i32, i32) {
    %c0_i32 = arith.constant 0 : i32
    %c0_i32_0 = arith.constant 0 : i32
    %c0_i32_1 = arith.constant 0 : i32
    %c0_i32_2 = arith.constant 0 : i32
    return %c0_i32, %c0_i32_0, %c0_i32_1 : i32, i32, i32
  }
  func.func @transform_2(%arg0: i32, %arg1: i32) -> (i32, i32) {
    %c0_i32 = arith.constant 0 : i32
    %c0_i32_0 = arith.constant 0 : i32
    %c0_i32_1 = arith.constant 0 : i32
    return %c0_i32, %c0_i32_0 : i32, i32
  }
  func.func @transform_3(%arg0: i32, %arg1: i32) -> (i32, i32, i32) {
    %c0_i32 = arith.constant 0 : i32
    %c0_i32_0 = arith.constant 0 : i32
    return %arg0, %c0_i32, %arg1 : i32, i32, i32
  }
}

</mosaic_0001>

<bundles_post_ra>
// kernel: split_bg_pallas.1
= control target key start
LH: loop header
LB: loop body
LE: loop exit
PB: predicated region body
PF: predicated region fallthrough
CT: control target
= control target key end

     0   :  { %s647_s12 = smov 0   ;;  %s649_s13 = smov 0   ;;  %s704_s0 = inlined_call_operand.vmem [shape: bf16[2,32,256], index: 0, kind: input, shape index: {}]   ;;  %s705_s1 = inlined_call_operand.vmem [shape: bf16[3,16,32], index: 1, kind: input, shape index: {}]   ;;  %s706_s2 = inlined_call_operand.vmem [shape: f32[16,3], index: 2, kind: input, shape index: {}]   ;;  %s707_s3 = inlined_call_operand.vmem [shape: f32[2,16,256], index: 3, kind: output, shape index: {}]  }
   0x1   :  { %s651_s14 = smov 0  }
   0x2 LB: > { %s25_s15 = sadd.s32 1, %s618_s13  ;;  %p537_p0 = scmp.ge.s32.totalorder %s622_s14, 1  ;;  %s622_s14 = sphi %s651_s14, %s13_s14   ;;  %s618_s13 = sphi %s649_s13, %s709_s13   ;;  %s614_s12 = sphi %s647_s12, %s708_s12  }
   0x3   : > { %p27_p1 = scmp.ge.s32.totalorder %s25_s15, 2  ;;  %p158_p2 = scmp.lt.s32.totalorder %s622_s14, 3 }
   0x5   : > { %s711_s15 = smov (%p27_p1, %s25_s15), 0  ;;  %p159_p3 = pnand %p537_p0, %p158_p2 }
   0x6   : > { %p191_p4 = scmp.lt.s32.totalorder (!%p159_p3), %s614_s12, 1  ;;  %v624_v0 = vmov (!%p159_p3), 0   ;;  %v219_v1 = vld [vmem:[%s706_s2] sm:$0xff] (!%p159_p3)  ;;  %v220_v2 = vld [vmem:[%s706_s2 + $0x8] sm:$0xff] (!%p159_p3)  ;;  %vm260_vm0 = vcmask (!%p159_p3), 261120   ;;  %v625_v8 = vmov (!%p159_p3), 1  }
   0x7   : > { %162 = sbr.rel (%p159_p3) target bundleno = 696 (0x2b8), region = 32  ;;  %296 = vmatprep.mubr.bf16.mxu0 (!%p159_p3), %v624_v0  ;;  %587 = vset.pattern.permute.xlu0 (!%p159_p3), %v624_v0  ;;  %v597_v7 = vld [vmem:[%s705_s1] sm:$0xff] (!%p159_p3)   ;;  %v598_v25 = vld [vmem:[%s705_s1 + $0x8] sm:$0xff] (!%p159_p3)   ;;  %vm326_vm1 = vcmask (!%p159_p3), 130048   ;;  %v626_v26 = vmov (!%p159_p3), 2   ;;  %v599_v43 = vld [vmem:[%s705_s1 + $0x10] sm:$0xff] (!%p159_p3)  }
   0x8   : > { %227 = vperm.xlu0 (!%p159_p3), %587, %v219_v1   ;;  %362 = vmatprep.mubr.bf16.mxu1 (!%p159_p3), %v624_v0 }
   0x9   : > { %588 = vset.pattern.permute.xlu1 (!%p159_p3), %v625_v8 }
   0xa   : > { %314 = vperm.xlu1 (!%p159_p3), %588, %v219_v1  }
   0xc   : > { %232 = vperm.xlu0 (!%p159_p3), %587, %v220_v2  }
   0xe   : > { %s713_s12 = smov (!%p191_p4, %s614_s12), 1  ;;  %318 = vperm.xlu1 %588, %v220_v2  }
   0xf   : > { %s558_s20 = sshll.u32 %s713_s12, 5 }
  0x10   : > { %s198_s23 = scalar_lea.vmem %s704_s0, %s558_s20  ;;  %589 = vset.pattern.permute.xlu0 %v626_v26  ;;  %s208_s5 = scalar_lea.vmem %s707_s3, %s558_s20 }
  0x11   : > { %v591_v3 = vld [vmem:[%s198_s23 + $0x4] ss:$8 sps:$4 sm:$0xff]   ;;  %v593_v4 = vld [vmem:[%s198_s23] ss:$8 sps:$4 sm:$0xff]   ;;  %v594_v5 = vld [vmem:[%s198_s23 + $0x14] ss:$8 sps:$4 sm:$0xff]   ;;  %380 = vperm.xlu0 %589, %v219_v1  }
  0x12   : > { %264 = vmatprep.subr.bf16.mxu0 %v591_v3  ;;  %v596_v6 = vld [vmem:[%s198_s23 + $0x10] ss:$8 sps:$4 sm:$0xff]   ;;  %590 = vset.pattern.permute.xlu1 %v626_v26 }
  0x13   : > { %265 = vmatpush1.bf16.msra.mxu0 %v593_v4  ;;  %384 = vperm.xlu1 %590, %v220_v2  }
  0x14   : > { %266 = vmatprep.subr.bf16.mxu0 %v594_v5 }
  0x17   : > { %267 = vmatpush1.bf16.msra.mxu0 %v596_v6 }
  0x1a   : > { %551 = vmatmul.mubr.msk.bf16.vlgmr.msra.gmra.mrb[0].mxu0 %vm260_vm0, %v597_v7 }
  0x87   : > { %v228_v9 = vpop.permute.xlu0 %227 }
  0x89   : > { %v315_v27 = vpop.permute.xlu1 %314 }
  0x8b   : > { %v233_v13 = vpop.permute.xlu0 %232 }
  0x8d   : > { %v319_v31 = vpop.permute.xlu1 %318 }
  0x90   : > { %v381_v44 = vpop.permute.xlu0 %380 }
  0x92   : > { %v385_v46 = vpop.permute.xlu1 %384 }
  0xed   : > { %v298_v10 = vpop.f32.mrb[0].mxu0 }
  0xee   : > { %v299_v11 = vadd.f32 %v298_v10, %v228_v9  ;;  %v300_v12 = vpop.f32.mrb[1].mxu0 }
  0xef   : > { %v301_v14 = vadd.f32 %v300_v12, %v228_v9  ;;  %v302_v15 = vpop.f32.mrb[2].mxu0 }
  0xf0   : > { %v303_v16 = vadd.f32 %v302_v15, %v233_v13  ;;  %v304_v17 = vpop.f32.mrb[3].mxu0  ;;  %v307_v19 = vmax.f32 %v299_v11, 0.0 }
  0xf1   : > { %v305_v18 = vadd.f32 %v304_v17, %v233_v13  ;;  %v308_v21 = vmax.f32 %v301_v14, 0.0 }
  0xf2   : > { %v309_v20 = vmax.f32 %v303_v16, 0.0 }
  0xf3   : > { %v310_v22 = vmax.f32 %v305_v18, 0.0 }
  0xf4   : > { %v311_v23 = vpack.c.bf16 %v309_v20, %v307_v19 }
  0xf5   : > { %v312_v24 = vpack.c.bf16 %v310_v22, %v308_v21 }
  0xf7   : > { %330 = vmatprep.subr.bf16.mxu1 %v312_v24 }
  0xf8   : > { %331 = vmatpush1.bf16.msra.mxu1 %v311_v23 }
  0xfb   : > { %553 = vmatmul.mubr.msk.bf16.vlgmr.msra.gmra.mrb[0].mxu1 %vm326_vm1, %v598_v25 }
  0xfc   : > { %427 = vmatprep.mubr.bf16.mxu1 %v624_v0 }
 0x1ce   : > { %v364_v28 = vpop.f32.mrb[0].mxu1 }
 0x1cf   : > { %v365_v29 = vadd.f32 %v364_v28, %v315_v27  ;;  %v366_v30 = vpop.f32.mrb[1].mxu1 }
 0x1d0   : > { %v367_v32 = vadd.f32 %v366_v30, %v315_v27  ;;  %v368_v33 = vpop.f32.mrb[2].mxu1 }
 0x1d1   : > { %v369_v34 = vadd.f32 %v368_v33, %v319_v31  ;;  %v370_v35 = vpop.f32.mrb[3].mxu1  ;;  %v373_v37 = vmax.f32 %v365_v29, 0.0 }
 0x1d2   : > { %v371_v36 = vadd.f32 %v370_v35, %v319_v31  ;;  %v374_v39 = vmax.f32 %v367_v32, 0.0 }
 0x1d3   : > { %v375_v38 = vmax.f32 %v369_v34, 0.0 }
 0x1d4   : > { %v376_v40 = vmax.f32 %v371_v36, 0.0 }
 0x1d5   : > { %v377_v41 = vpack.c.bf16 %v375_v38, %v373_v37 }
 0x1d6   : > { %v378_v42 = vpack.c.bf16 %v376_v40, %v374_v39 }
 0x1d8   : > { %395 = vmatprep.subr.bf16.mxu1 %v378_v42 }
 0x1d9   : > { %396 = vmatpush1.bf16.msra.mxu1 %v377_v41 }
 0x1dc   : > { %555 = vmatmul.mubr.msk.bf16.vlgmr.msra.gmra.mrb[4].mxu1 %vm326_vm1, %v599_v43 }
 0x2af   : > { %v429_v45 = vpop.f32.mrb[4].mxu1 }
 0x2b0   : > { %v431_v47 = vpop.f32.mrb[5].mxu1  ;;  %v430_v48 = vadd.f32 %v429_v45, %v381_v44 }
 0x2b1   : > { %v433_v49 = vpop.f32.mrb[6].mxu1  ;;  %v432_v50 = vadd.f32 %v431_v47, %v381_v44 }
 0x2b2   : > { %v434_v51 = vadd.f32 %v433_v49, %v385_v46  ;;  %v438_v52 = vmax.f32 %v430_v48, 0.0  ;;  %v435_v53 = vpop.f32.mrb[7].mxu1 }
 0x2b3   : > { %v439_v54 = vmax.f32 %v432_v50, 0.0  ;;  %v436_v55 = vadd.f32 %v435_v53, %v385_v46 }
 0x2b4   : > { %v440_v56 = vmax.f32 %v434_v51, 0.0  ;;  %442 = vst [vmem:[%s208_s5] sm:$0xff] %v438_v52 }
 0x2b5   : > { %443 = vst [vmem:[%s208_s5 + $0x8] sm:$0xff] %v439_v54  ;;  %v441_v57 = vmax.f32 %v436_v55, 0.0 }
 0x2b6   : > { %444 = vst [vmem:[%s208_s5 + $0x10] sm:$0xff] %v440_v56 }
 0x2b7   : > { %445 = vst [vmem:[%s208_s5 + $0x18] sm:$0xff] %v441_v57 }
 0x2b8 PF: > { %s13_s14 = sadd.s32 1, %s622_s14   ;;  %s708_s12 = smov %s618_s13 }
 0x2b9   : > { %p10_p5 = scmp.ge.s32.totalorder %s13_s14, 4   ;;  %s709_s13 = smov %s711_s15 }
 0x2bb   :  { %12 = sbr.rel (!%p10_p5) target bundleno = 2 (0x2), region = 64 }

</bundles_post_ra>
